<compile_context>
chip_gen: v7x
topology: tpu7x:2x2x1
jax: 0.10.0
libtpu: 0.0.40
codegen_flags: <defaults>
</compile_context>

<pallas_src>
from functools import partial

import jax
import jax.numpy as jnp
from jax.experimental import pallas as pl
from jax.experimental.pallas import tpu as pltpu


def _mlp_kernel(xt_ref,
                w1_ref, b1_ref,
                w2_ref, b2_ref,
                w3_ref, b3_ref,
                o_ref,
                *, precision):
    xt = xt_ref[...]                                             # [D, TB]

    # Layer 1: (BN-folded) Linear -> ReLU.  Dropout(p=0.3) is identity in eval.
    h1 = jnp.dot(w1_ref[...], xt,
                 preferred_element_type=jnp.float32, precision=precision)
    h1 = jnp.maximum(h1 + b1_ref[...], 0.0)                      # [32, TB] f32

    # Layer 2: (BN-folded) Linear -> ReLU.  Dropout(p=0.2) is identity in eval.
    # Kept fully in f32 (no h1 repack): MXU-trivial, and avoids bf16 VPU work
    # that v5e cannot do natively.
    h2 = jnp.dot(w2_ref[...], h1,
                 preferred_element_type=jnp.float32, precision=precision)
    h2 = jnp.maximum(h2 + b2_ref[...], 0.0)                      # [16, TB] f32

    # Output head Linear(16, 1): VPU multiply + 16-wide sublane reduce,
    # written as a lane-dense [1, TB] slab.
    o_ref[...] = (jnp.sum(h2 * w3_ref[...], axis=0, keepdims=True)
                  + b3_ref[...])                                 # [1, TB] f32


def _num_tensorcores_per_chip():
    """Best-effort TensorCore count per chip (v5e/v6e: 1, v7x: 2)."""
    try:
        kind = jax.devices()[0].device_kind.lower()
    except Exception:
        return 1
    if "v5" in kind or "v6" in kind or "lite" in kind:
        return 1
    if "7" in kind:
        return 2
    return 1


def _round_up(a, m):
    return ((a + m - 1) // m) * m


@partial(jax.jit,
         static_argnames=("feature_major", "dtype", "precision", "tb", "x_buffers"))
def bike_volume_nn_forward(x, params, *, feature_major=False, dtype=jnp.float32,
                           precision=jax.lax.Precision.HIGHEST, tb=None,
                           x_buffers=None):
    """Eval-mode BikeVolumeNN forward.

    x: [B, input_dim] (PyTorch layout), or [input_dim, B] with feature_major=True
       (preferred: zero layout pre-pass, the kernel streams x straight from HBM).
    Returns [B, 1] float32.
    """
    eps = 1e-5
    LANE = 128

    w1, b1, g1, be1, m1, v1 = params["l1"]
    w2, b2, g2, be2, m2, v2 = params["l2"]
    w3, b3 = params["l3"]
    D = w1.shape[1]

    if feature_major:
        assert x.shape[0] == D, "feature_major=True expects x of shape [input_dim, B]"
        B = x.shape[1]
        xt = x
    else:
        assert x.shape[1] == D, "expects x of shape [B, input_dim]"
        B = x.shape[0]
        xt = x.T      # fuses with the pad/cast below into ONE XLA pass (under jit)

    # ---- Fold eval-mode BatchNorm into the Linear weights/biases (f32 math).
    def fold(w, b, gamma, beta, mean, var):
        scale = gamma / jnp.sqrt(var + eps)
        return w * scale[:, None], b * scale + (beta - mean * scale)

    w1f, b1f = fold(w1, b1, g1, be1, m1, v1)          # [32, D], [32]
    w2f, b2f = fold(w2, b2, g2, be2, m2, v2)          # [16, 32], [16]
    H1, H2 = w1f.shape[0], w2f.shape[0]

    # ---- Batch-tile selection (lane-dense, VMEM-budget-sized, capped at 32768).
    # Per-lane VMEM: double-buffered x column + f32 h1/h2 temporaries +
    # double-buffered output column; keep total under half the scoped limit.
    vmem_limit = 32 * 1024 * 1024
    if tb is None:
        bytes_per_lane = 2 * D * jnp.dtype(dtype).itemsize + (H1 + H2) * 4 + 2 * 4
        tb_cap = (vmem_limit // 2) // bytes_per_lane
        tb_cap = max(LANE, min(32768, (tb_cap // LANE) * LANE))
    else:
        tb_cap = max(LANE, (tb // LANE) * LANE)

    n_tc = _num_tensorcores_per_chip()
    chunks = -(-B // LANE)                             # 128-lane chunks covering B
    grid_n = max(1, -(-chunks // (tb_cap // LANE)))    # steps needed at tb_cap
    if n_tc > 1 and chunks >= n_tc:
        # v7x: give both TensorCores balanced halves (grid_n multiple of n_tc).
        grid_n = _round_up(max(grid_n, n_tc), n_tc)
    tile_chunks = -(-chunks // grid_n)
    tbv = tile_chunks * LANE
    Bp = grid_n * tbv

    # Zero-pad ragged batches along the lane axis.  Padded columns carry
    # relu(bias)-derived junk that is sliced off below; nothing in the kernel
    # reduces over the batch axis, so they never contaminate real outputs.
    xt = xt.astype(dtype)
    if Bp != B:
        xt = jnp.pad(xt, ((0, 0), (0, Bp - B)))

    f32 = jnp.float32
    col = lambda v: v.reshape(-1, 1).astype(f32)
    resident = lambda shape: pl.BlockSpec(shape, lambda i: (0, 0))

    if x_buffers is None:
        x_spec = pl.BlockSpec((D, tbv), lambda i: (0, i))
    else:
        x_spec = pl.BlockSpec((D, tbv), lambda i: (0, i),
                              pipeline_mode=pl.Buffered(x_buffers))

    if n_tc > 1 and grid_n % n_tc == 0:
        semantics = (pltpu.CORE_PARALLEL,)             # real 2-TC split on v7x
    else:
        semantics = (pltpu.ARBITRARY,)                 # single TC: no forced 2nd step

    out = pl.pallas_call(
        partial(_mlp_kernel, precision=precision),
        out_shape=jax.ShapeDtypeStruct((1, Bp), f32),
        grid_spec=pltpu.PrefetchScalarGridSpec(
            num_scalar_prefetch=0,
            grid=(grid_n,),
            in_specs=[
                x_spec,                                # streaming x^T batch tile
                # Constant index maps: weights/biases stay VMEM-resident across
                # grid steps (no per-step re-DMA); they are tiny.
                resident((H1, D)), resident((H1, 1)),
                resident((H2, H1)), resident((H2, 1)),
                resident((H2, 1)), resident((1, 1)),
            ],
            out_specs=pl.BlockSpec((1, tbv), lambda i: (0, i)),
        ),
        compiler_params=pltpu.CompilerParams(
            dimension_semantics=semantics,
            vmem_limit_bytes=vmem_limit,
        ),
    )(xt,
      w1f.astype(dtype), col(b1f),
      w2f.astype(f32), col(b2f),                       # layer 2 stays f32
      col(w3),                                         # w3 [1,16] -> column [16,1]
      col(b3))

    return out[:, :B].reshape(B, 1)                    # [B, 1] f32


def _make_params(key, input_dim):
    """Deterministic synthetic parameters matching BikeVolumeNN(num_layers=2)."""
    ks = jax.random.split(key, 12)

    def lin(kw, kb, fan_in, fan_out):
        bound = 1.0 / jnp.sqrt(fan_in)
        w = jax.random.uniform(kw, (fan_out, fan_in), jnp.float32, -bound, bound)
        b = jax.random.uniform(kb, (fan_out,), jnp.float32, -bound, bound)
        return w, b

    def bn(kg, kb, km, kv, n):
        gamma = 1.0 + 0.1 * jax.random.normal(kg, (n,), jnp.float32)
        beta = 0.1 * jax.random.normal(kb, (n,), jnp.float32)
        mean = 0.1 * jax.random.normal(km, (n,), jnp.float32)
        var = jax.random.uniform(kv, (n,), jnp.float32, 0.5, 1.5)
        return gamma, beta, mean, var

    w1, b1 = lin(ks[0], ks[1], input_dim, 32)
    g1, be1, m1, v1 = bn(ks[2], ks[3], ks[4], ks[5], 32)
    w2, b2 = lin(ks[6], ks[7], 32, 16)
    g2, be2, m2, v2 = bn(ks[8], ks[9], ks[10], ks[11], 16)
    w3, b3 = lin(jax.random.fold_in(key, 100), jax.random.fold_in(key, 101), 16, 1)
    return {"l1": (w1, b1, g1, be1, m1, v1),
            "l2": (w2, b2, g2, be2, m2, v2),
            "l3": (w3, b3)}


def _reference_forward(x, params):
    """Pure-JAX reference of the PyTorch eval-mode forward."""
    eps = 1e-5
    w1, b1, g1, be1, m1, v1 = params["l1"]
    w2, b2, g2, be2, m2, v2 = params["l2"]
    w3, b3 = params["l3"]
    h = x @ w1.T + b1
    h = (h - m1) / jnp.sqrt(v1 + eps) * g1 + be1
    h = jnp.maximum(h, 0.0)
    h = h @ w2.T + b2
    h = (h - m2) / jnp.sqrt(v2 + eps) * g2 + be2
    h = jnp.maximum(h, 0.0)
    return h @ w3.T + b3


if __name__ == "__main__":
    key = jax.random.PRNGKey(0)
    kx, kp = jax.random.split(key)

    B, input_dim = 256, 8          # small shapes: 256 samples, 8 features
    x = jax.random.normal(kx, (B, input_dim), jnp.float32)
    params = _make_params(kp, input_dim)
    ref = _reference_forward(x, params)

    # 1) Batch-major [B, D] input (PyTorch layout); layout glue fuses under jit.
    out = jax.block_until_ready(bike_volume_nn_forward(x, params))
    assert out.shape == (B, 1)
    assert jnp.allclose(out, ref, atol=1e-4, rtol=1e-4), "f32 batch-major mismatch"

    # 2) Feature-major [D, B] input + ragged batch: zero layout pre-pass path
    #    (the transpose here only simulates a caller that already holds x^T).
    Br = 200
    x_fm = jnp.asarray(x[:Br].T)
    out_fm = jax.block_until_ready(
        bike_volume_nn_forward(x_fm, params, feature_major=True))
    assert out_fm.shape == (Br, 1)
    assert jnp.allclose(out_fm, ref[:Br], atol=1e-4, rtol=1e-4), "feature-major mismatch"

    # 3) bf16 HBM-traffic path (f32 MXU accumulation, layer 2 in f32).  Use only
    #    for standardized features; keep dtype=f32 for un-normalized inputs.
    out_bf16 = jax.block_until_ready(
        bike_volume_nn_forward(x, params, dtype=jnp.bfloat16))
    assert out_bf16.shape == (B, 1)
    assert jnp.allclose(out_bf16, ref, atol=5e-2, rtol=5e-2), "bf16 mismatch"

    print("KERNEL_OK")
</pallas_src>

<mosaic_0001>
module attributes {stable_mosaic.version = 11 : i64} {
  func.func @_mlp_kernel(%arg0: i32, %arg1: memref<8x256xf32, #tpu.memory_space<vmem>>, %arg2: memref<32x8xf32, #tpu.memory_space<vmem>>, %arg3: memref<32x1xf32, #tpu.memory_space<vmem>>, %arg4: memref<16x32xf32, #tpu.memory_space<vmem>>, %arg5: memref<16x1xf32, #tpu.memory_space<vmem>>, %arg6: memref<16x1xf32, #tpu.memory_space<vmem>>, %arg7: memref<1x1xf32, #tpu.memory_space<vmem>>, %arg8: memref<1x256xf32, #tpu.memory_space<vmem>>) attributes {dimension_semantics = [#tpu.dimension_semantics<arbitrary>], iteration_bounds = array<i64: 1>, scalar_prefetch = 0 : i64, scratch_operands = 0 : i64, tpu.core_type = #tpu.core_type<tc>, window_params = [{transform_indices = @transform_0, window_bounds = array<i64: 8, 256>}, {pipeline_mode = #tpu.pipeline_mode<synchronous>, transform_indices = @transform_1, window_bounds = array<i64: 32, 8>}, {pipeline_mode = #tpu.pipeline_mode<synchronous>, transform_indices = @transform_2, window_bounds = array<i64: 32, 1>}, {pipeline_mode = #tpu.pipeline_mode<synchronous>, transform_indices = @transform_3, window_bounds = array<i64: 16, 32>}, {pipeline_mode = #tpu.pipeline_mode<synchronous>, transform_indices = @transform_4, window_bounds = array<i64: 16, 1>}, {pipeline_mode = #tpu.pipeline_mode<synchronous>, transform_indices = @transform_5, window_bounds = array<i64: 16, 1>}, {pipeline_mode = #tpu.pipeline_mode<synchronous>, transform_indices = @transform_6, window_bounds = array<i64: 1, 1>}, {transform_indices = @transform_7, window_bounds = array<i64: 1, 256>}]} {
    %c0 = arith.constant 0 : index
    %c0_0 = arith.constant 0 : index
    %0 = vector.load %arg1[%c0, %c0_0] : memref<8x256xf32, #tpu.memory_space<vmem>>, vector<8x256xf32>
    %c0_1 = arith.constant 0 : index
    %c0_2 = arith.constant 0 : index
    %1 = vector.load %arg2[%c0_1, %c0_2] : memref<32x8xf32, #tpu.memory_space<vmem>>, vector<32x8xf32>
    %cst = arith.constant dense<0.000000e+00> : vector<32x256xf32>
    %2 = tpu.matmul %1, %0, %cst {dimension_numbers = #tpu.dot_dimension_numbers<[1], [0], [0], [1], [0, 0, 1, 1], [], []>, precision = #tpu.contract_precision<fp32>} : vector<32x8xf32>, vector<8x256xf32>, vector<32x256xf32> -> vector<32x256xf32>
    %c0_3 = arith.constant 0 : index
    %c0_4 = arith.constant 0 : index
    %3 = vector.load %arg3[%c0_3, %c0_4] : memref<32x1xf32, #tpu.memory_space<vmem>>, vector<32x1xf32>
    %4 = vector.broadcast %3 : vector<32x1xf32> to vector<32x256xf32>
    %5 = arith.addf %2, %4 : vector<32x256xf32>
    %cst_5 = arith.constant 0.000000e+00 : f32
    %6 = vector.broadcast %cst_5 : f32 to vector<32x256xf32>
    %7 = arith.maximumf %5, %6 : vector<32x256xf32>
    %c0_6 = arith.constant 0 : index
    %c0_7 = arith.constant 0 : index
    %8 = vector.load %arg4[%c0_6, %c0_7] : memref<16x32xf32, #tpu.memory_space<vmem>>, vector<16x32xf32>
    %cst_8 = arith.constant dense<0.000000e+00> : vector<16x256xf32>
    %9 = tpu.matmul %8, %7, %cst_8 {dimension_numbers = #tpu.dot_dimension_numbers<[1], [0], [0], [1], [0, 0, 1, 1], [], []>, precision = #tpu.contract_precision<fp32>} : vector<16x32xf32>, vector<32x256xf32>, vector<16x256xf32> -> vector<16x256xf32>
    %c0_9 = arith.constant 0 : index
    %c0_10 = arith.constant 0 : index
    %10 = vector.load %arg5[%c0_9, %c0_10] : memref<16x1xf32, #tpu.memory_space<vmem>>, vector<16x1xf32>
    %11 = vector.broadcast %10 : vector<16x1xf32> to vector<16x256xf32>
    %12 = arith.addf %9, %11 : vector<16x256xf32>
    %cst_11 = arith.constant 0.000000e+00 : f32
    %13 = vector.broadcast %cst_11 : f32 to vector<16x256xf32>
    %14 = arith.maximumf %12, %13 : vector<16x256xf32>
    %c0_12 = arith.constant 0 : index
    %c0_13 = arith.constant 0 : index
    %15 = vector.load %arg6[%c0_12, %c0_13] : memref<16x1xf32, #tpu.memory_space<vmem>>, vector<16x1xf32>
    %16 = vector.broadcast %15 : vector<16x1xf32> to vector<16x256xf32>
    %17 = arith.mulf %14, %16 : vector<16x256xf32>
    %cst_14 = arith.constant dense<0.000000e+00> : vector<256xf32>
    %18 = vector.multi_reduction <add>, %17, %cst_14 [0] : vector<16x256xf32> to vector<256xf32>
    %19 = vector.shape_cast %18 : vector<256xf32> to vector<1x256xf32>
    %c0_15 = arith.constant 0 : index
    %c0_16 = arith.constant 0 : index
    %20 = vector.load %arg7[%c0_15, %c0_16] : memref<1x1xf32, #tpu.memory_space<vmem>>, vector<1x1xf32>
    %21 = vector.broadcast %20 : vector<1x1xf32> to vector<1x256xf32>
    %22 = arith.addf %19, %21 : vector<1x256xf32>
    %c0_17 = arith.constant 0 : index
    %c0_18 = arith.constant 0 : index
    %23 = vector.load %arg8[%c0_17, %c0_18] : memref<1x256xf32, #tpu.memory_space<vmem>>, vector<1x256xf32>
    tpu.vector_store %arg8[%c0_17, %c0_18], %22 {strides = array<i32>} : memref<1x256xf32, #tpu.memory_space<vmem>>, vector<1x256xf32>,
    return
  }
  func.func @transform_0(%arg0: i32) -> (i32, i32) {
    %c0_i32 = arith.constant 0 : i32
    %c0_i32_0 = arith.constant 0 : i32
    return %c0_i32, %arg0 : i32, i32
  }
  func.func @transform_1(%arg0: i32) -> (i32, i32) {
    %c0_i32 = arith.constant 0 : i32
    %c0_i32_0 = arith.constant 0 : i32
    %c0_i32_1 = arith.constant 0 : i32
    return %c0_i32, %c0_i32_0 : i32, i32
  }
  func.func @transform_2(%arg0: i32) -> (i32, i32) {
    %c0_i32 = arith.constant 0 : i32
    %c0_i32_0 = arith.constant 0 : i32
    %c0_i32_1 = arith.constant 0 : i32
    return %c0_i32, %c0_i32_0 : i32, i32
  }
  func.func @transform_3(%arg0: i32) -> (i32, i32) {
    %c0_i32 = arith.constant 0 : i32
    %c0_i32_0 = arith.constant 0 : i32
    %c0_i32_1 = arith.constant 0 : i32
    return %c0_i32, %c0_i32_0 : i32, i32
  }
  func.func @transform_4(%arg0: i32) -> (i32, i32) {
    %c0_i32 = arith.constant 0 : i32
    %c0_i32_0 = arith.constant 0 : i32
    %c0_i32_1 = arith.constant 0 : i32
    return %c0_i32, %c0_i32_0 : i32, i32
  }
  func.func @transform_5(%arg0: i32) -> (i32, i32) {
    %c0_i32 = arith.constant 0 : i32
    %c0_i32_0 = arith.constant 0 : i32
    %c0_i32_1 = arith.constant 0 : i32
    return %c0_i32, %c0_i32_0 : i32, i32
  }
  func.func @transform_6(%arg0: i32) -> (i32, i32) {
    %c0_i32 = arith.constant 0 : i32
    %c0_i32_0 = arith.constant 0 : i32
    %c0_i32_1 = arith.constant 0 : i32
    return %c0_i32, %c0_i32_0 : i32, i32
  }
  func.func @transform_7(%arg0: i32) -> (i32, i32) {
    %c0_i32 = arith.constant 0 : i32
    %c0_i32_0 = arith.constant 0 : i32
    return %c0_i32, %arg0 : i32, i32
  }
}

</mosaic_0001>

<bundles_post_ra>
// kernel: bike_volume_nn_forward.1
= control target key start
LH: loop header
LB: loop body
LE: loop exit
PB: predicated region body
PF: predicated region fallthrough
CT: control target
= control target key end

     0   :  { %s1828_s0 = inlined_call_operand.vmem [shape: f32[8,256], index: 0, kind: input, shape index: {}]   ;;  %s1829_s1 = inlined_call_operand.vmem [shape: f32[32,8], index: 1, kind: input, shape index: {}]   ;;  %s1830_s2 = inlined_call_operand.vmem [shape: f32[32,1], index: 2, kind: input, shape index: {}]   ;;  %s1831_s3 = inlined_call_operand.vmem [shape: f32[16,32], index: 3, kind: input, shape index: {}]   ;;  %s1832_s4 = inlined_call_operand.vmem [shape: f32[16,1], index: 4, kind: input, shape index: {}]   ;;  %s1833_s5 = inlined_call_operand.vmem [shape: f32[16,1], index: 5, kind: input, shape index: {}]   ;;  %s1834_s6 = inlined_call_operand.<no memory space> [shape: f32[1,1], index: 6, kind: input, shape index: {}]   ;;  %s1835_s7 = inlined_call_operand.hbm [shape: f32[1,256], index: 7, kind: output, shape index: {}]  }
   0x1   :  { %v12_v0 = vstv %s1834_s6 }
   0x2   :  { %13 = vst [vmem:[#allocation2] sm:$0x1] %v12_v0 }
   0x3   :  { %v30_v1 = vld [vmem:[%s1828_s0 + $0x8] sm:$0xff]  ;;  %v29_v2 = vld [vmem:[%s1828_s0] sm:$0xff]  ;;  %vm59_vm0 = vcmask 64512   ;;  %v1540_v6 = vmov 0.0   ;;  %v33_v9 = vld [vmem:[%s1829_s1 + $0x10] sm:$0xff]  ;;  %v1541_v14 = vmov 0  }
   0x4   :  { %v31_v3 = vld [vmem:[%s1829_s1] sm:$0xff]  ;;  %v1596_v4 = vand.u32 4294901760, %v30_v1  ;;  %v1598_v5 = vand.u32 4294901760, %v29_v2  ;;  %257 = vmatprep.mubr.f32.mxu0 %v1540_v6  ;;  %v32_v8 = vld [vmem:[%s1829_s1 + $0x8] sm:$0xff]  ;;  %138 = vmatprep.mubr.f32.mxu1 %v1540_v6  ;;  %v67_v12 = vsel %vm59_vm0, %v33_v9, 0  ;;  %v34_v13 = vld [vmem:[%s1829_s1 + $0x18] sm:$0xff] }
   0x5   :  { %v61_v7 = vsel %vm59_vm0, %v31_v3, 0  ;;  %v64_v11 = vsel %vm59_vm0, %v32_v8, 0  ;;  %1514 = vset.pattern.permute.xlu0 %v1541_v14  ;;  %v35_v15 = vld [vmem:[%s1830_s2] sm:$0xff]  ;;  %1515 = vset.pattern.permute.xlu1 %v1541_v14  ;;  %v37_v19 = vld [vmem:[%s1830_s2 + $0x10] sm:$0xff]  ;;  %v1634_v21 = vand.u32 4294901760, %v67_v12  ;;  %v36_v22 = vld [vmem:[%s1830_s2 + $0x8] sm:$0xff] }
   0x6   :  { %v1609_v10 = vand.u32 4294901760, %v61_v7  ;;  %v1620_v16 = vsub.f32 %v30_v1, %v1596_v4  ;;  %v1623_v17 = vsub.f32 %v29_v2, %v1598_v5  ;;  %v1625_v18 = vand.u32 4294901760, %v64_v11  ;;  %73 = vmatprep.subr.mxu1 %v1596_v4  ;;  %41 = vperm.xlu0 %1514, %v35_v15   ;;  %v38_v27 = vld [vmem:[%s1830_s2 + $0x18] sm:$0xff] }
   0x7   :  { %75 = vmatpush1.msra.mxu1 %v1598_v5  ;;  %51 = vperm.xlu1 %1515, %v37_v19   ;;  %v70_v26 = vsel %vm59_vm0, %v34_v13, 0 }
   0x8   :  { %v1632_v20 = vsub.f32 %v61_v7, %v1609_v10  ;;  %v185_v23 = vand.u32 4294901760, %v1620_v16  ;;  %v191_v24 = vand.u32 4294901760, %v1623_v17  ;;  %v1643_v25 = vsub.f32 %v64_v11, %v1625_v18 }
   0x9   :  { %14 = vsyncpa [#allocation4], 0  ;;  %v1656_v32 = vsub.f32 %v67_v12, %v1634_v21  ;;  %v1658_v33 = vand.u32 4294901760, %v70_v26  ;;  %v694_v43 = vld [vmem:[%s1832_s4] sm:$0xff]  ;;  %v695_v47 = vld [vmem:[%s1832_s4 + $0x8] sm:$0xff]  ;;  %vm706_vm1 = vcmask 261120  }
   0xa   :  { %v141_v28 = vand.u32 4294901760, %v1632_v20  ;;  %v186_v29 = vsub.f32 %v1620_v16, %v185_v23  ;;  %v192_v30 = vsub.f32 %v1623_v17, %v191_v24  ;;  %v152_v31 = vand.u32 4294901760, %v1643_v25  ;;  %46 = vperm.xlu0 %1514, %v36_v22   ;;  %v1309_v48 = vld [vmem:[%s1833_s5] sm:$0xff]  ;;  %v1310_v50 = vld [vmem:[%s1833_s5 + $0x8] sm:$0xff] }
   0xb   :  { %56 = vperm.xlu1 %1515, %v38_v27   ;;  %v163_v38 = vand.u32 4294901760, %v1656_v32  ;;  %v173_v40 = vsub.f32 %v70_v26, %v1658_v33  ;;  %v1339_v51 = vld [vmem:[#allocation2] sm:$0x1]  ;;  %v693_v62 = vld [vmem:[%s1831_s3 + $0x8] sm:$0xff] }
   0xc   :  { %v142_v34 = vsub.f32 %v1632_v20, %v141_v28  ;;  %v187_v35 = vand.u32 4294901760, %v186_v29  ;;  %v193_v36 = vand.u32 4294901760, %v192_v30  ;;  %v153_v37 = vsub.f32 %v1643_v25, %v152_v31  ;;  %v692_v60 = vld [vmem:[%s1831_s3] sm:$0xff]  ;;  %s1543_s3 = smov [#allocation3]  }
   0xd   :  { %v164_v42 = vsub.f32 %v1656_v32, %v163_v38  ;;  %v174_v44 = vand.u32 4294901760, %v173_v40  ;;  %v708_v61 = vsel %vm706_vm1, %v692_v60, 0  ;;  %v711_v1 = vsel %vm706_vm1, %v693_v62, 0  ;;  %s1380_s29 = sshll.u32 %s1543_s3, 4  ;;  %s1381_s29 = int_to_ptr.vmem [resolvable:$true] %s1380_s29 }
   0xe   :  { %v143_v39 = vand.u32 4294901760, %v142_v34  ;;  %188 = vmatprep.subr.mxu0 %v187_v35  ;;  %1436 = vmatprep.subr.mxu1 %v187_v35  ;;  %v154_v41 = vand.u32 4294901760, %v153_v37  ;;  %v1737_v63 = vand.u32 4294901760, %v708_v61  ;;  %v1742_v7 = vand.u32 4294901760, %v711_v1  ;;  %s1516_s30 = scalar_lea.vmem %s1381_s29, 32  ;;  %p1521_p1 = scmp.lt.s32.totalorder %s1381_s29, %s1381_s29 }
   0xf   :  { %194 = vmatpush1.msra.mxu0 %v193_v36  ;;  %v165_v45 = vand.u32 4294901760, %v164_v42  ;;  %v175_v46 = vsub.f32 %v173_v40, %v174_v44  ;;  %698 = vperm.xlu0 %1514, %v694_v43   ;;  %p1517_p0 = scmp.ne.s32.totalorder %s1381_s29, %s1516_s30  ;;  %p1522_p2 = scmp.lt.s32.totalorder %s1516_s30, %s1516_s30 }
  0x10   :  { %144 = vmatmul.mubr.f32.vlgmr.msra.gmra.mrb[0].mxu1 %v143_v39  ;;  %259 = vmatmul.mubr.f32.vlgmr.msra.gmra.mrb[0].mxu0 %v1609_v10  ;;  %v1740_v3 = vsub.f32 %v708_v61, %v1737_v63  ;;  %v1746_v19 = vsub.f32 %v711_v1, %v1742_v7 }
  0x11   :  { %288 = vmatprep.subr.mxu0 %v1620_v16  ;;  %264 = vmatprep.mubr.f32.mxu0 %v1540_v6  ;;  %v176_v49 = vand.u32 4294901760, %v175_v46  ;;  %p1523_p3 = por %p1522_p2, %p1521_p1 }
  0x12   :  { %291 = vmatpush1.msra.mxu0 %v1623_v17  ;;  %149 = vmatprep.mubr.f32.mxu1 %v1540_v6  ;;  %v788_v15 = vand.u32 4294901760, %v1740_v3  ;;  %v799_v34 = vand.u32 4294901760, %v1746_v19 }
  0x13   :  { %388 = vmatprep.subr.mxu0 %v1596_v4  ;;  %1437 = vmatpush1.msra.mxu1 %v193_v36  ;;  %p1524_p4 = pnand %p1523_p3, %p1517_p0 }
  0x14   :  { %155 = vmatmul.mubr.f32.gmra.mrb[2].mxu1 %v154_v41  ;;  %266 = vmatmul.mubr.f32.gmra.mrb[2].mxu0 %v1625_v18 }
  0x15   :  { %160 = vmatprep.mubr.f32.mxu1 %v1540_v6  ;;  %354 = vmatprep.mubr.f32.mxu0 %v1540_v6 }
  0x16   :  { %703 = vperm.xlu1 %1515, %v695_v47   ;;  %1313 = vperm.xlu0 %1514, %v1309_v48  }
  0x18   :  { %166 = vmatmul.mubr.f32.gmra.mrb[4].mxu1 %v165_v45  ;;  %357 = vmatmul.mubr.f32.vlgmr.msra.gmra.mrb[0].mxu0 %v1632_v20 }
  0x19   :  { %171 = vmatprep.mubr.f32.mxu1 %v1540_v6  ;;  %390 = vmatpush1.msra.mxu0 %v1598_v5 }
  0x1a   :  { %362 = vmatprep.mubr.f32.mxu0 %v1540_v6  ;;  %493 = vmatprep.subr.mxu0 %v185_v23 }
  0x1b   :  { %1318 = vperm.xlu1 %1515, %v1310_v50   ;;  %1342 = vperm.xlu0 %1514, %v1339_v51  }
  0x1c   :  { %177 = vmatmul.mubr.f32.gmra.mrb[6].mxu1 %v176_v49  ;;  %365 = vmatmul.mubr.f32.gmra.mrb[2].mxu0 %v1643_v25 }
  0x1d   :  { %271 = vmatprep.mubr.f32.mxu1 %v1540_v6  ;;  %370 = vmatprep.mubr.f32.mxu0 %v1540_v6 }
  0x20   :  { %273 = vmatmul.mubr.f32.vlgmr.msra.gmra.mrb[4].mxu1 %v1634_v21  ;;  %373 = vmatmul.mubr.f32.gmra.mrb[4].mxu0 %v1656_v32 }
  0x21   :  { %278 = vmatprep.mubr.f32.mxu1 %v1540_v6  ;;  %378 = vmatprep.mubr.f32.mxu0 %v1540_v6 }
  0x24   :  { %280 = vmatmul.mubr.f32.gmra.mrb[6].mxu1 %v1658_v33  ;;  %381 = vmatmul.mubr.f32.gmra.mrb[6].mxu0 %v173_v40 }
  0x25   :  { %785 = vmatprep.mubr.f32.mxu1 %v1540_v6  ;;  %453 = vmatprep.mubr.f32.mxu0 %v1540_v6 }
  0x28   :  { %457 = vmatmul.mubr.f32.vlgmr.msra.gmra.mrb[0].mxu0 %v141_v28  ;;  %v1753_v28 = vsub.f32 %v1740_v3, %v788_v15 }
  0x29   :  { %497 = vmatpush1.msra.mxu0 %v191_v24  ;;  %462 = vmatprep.mubr.f32.mxu0 %v1540_v6 }
  0x2a   :  { %590 = vmatprep.subr.mxu0 %v1596_v4 }
  0x2c   :  { %466 = vmatmul.mubr.f32.gmra.mrb[2].mxu0 %v152_v31 }
  0x2d   :  { %471 = vmatprep.mubr.f32.mxu0 %v1540_v6 }
  0x30   :  { %475 = vmatmul.mubr.f32.gmra.mrb[4].mxu0 %v163_v38 }
  0x31   :  { %480 = vmatprep.mubr.f32.mxu0 %v1540_v6 }
  0x34   :  { %484 = vmatmul.mubr.f32.gmra.mrb[6].mxu0 %v174_v44 }
  0x35   :  { %560 = vmatprep.mubr.f32.mxu0 %v1540_v6 }
  0x38   :  { %562 = vmatmul.mubr.f32.vlgmr.msra.gmra.mrb[0].mxu0 %v1609_v10 }
  0x39   :  { %592 = vmatpush1.msra.mxu0 %v1598_v5  ;;  %567 = vmatprep.mubr.f32.mxu0 %v1540_v6 }
  0x3c   :  { %569 = vmatmul.mubr.f32.gmra.mrb[2].mxu0 %v1625_v18 }
  0x3d   :  { %574 = vmatprep.mubr.f32.mxu0 %v1540_v6 }
  0x40   :  { %576 = vmatmul.mubr.f32.gmra.mrb[4].mxu0 %v1634_v21 }
  0x41   :  { %581 = vmatprep.mubr.f32.mxu0 %v1540_v6 }
  0x44   :  { %583 = vmatmul.mubr.f32.gmra.mrb[6].mxu0 %v1658_v33 }
  0x45   :  { %655 = vmatprep.mubr.f32.mxu0 %v1540_v6 }
  0x48   :  { %657 = vmatmul.mubr.f32.vlgmr.msra.gmra.mrb[0].mxu0 %v1609_v10 }
  0x49   :  { %662 = vmatprep.mubr.f32.mxu0 %v1540_v6 }
  0x4c   :  { %664 = vmatmul.mubr.f32.gmra.mrb[2].mxu0 %v1625_v18 }
  0x4d   :  { %669 = vmatprep.mubr.f32.mxu0 %v1540_v6 }
  0x50   :  { %671 = vmatmul.mubr.f32.gmra.mrb[4].mxu0 %v1634_v21 }
  0x51   :  { %676 = vmatprep.mubr.f32.mxu0 %v1540_v6 }
  0x54   :  { %678 = vmatmul.mubr.f32.gmra.mrb[6].mxu0 %v1658_v33 }
  0x85   :  { %v42_v0 = vpop.permute.xlu0 %41 }
  0x86   :  { %v52_v11 = vpop.permute.xlu1 %51 }
  0x89   :  { %v47_v10 = vpop.permute.xlu0 %46 }
  0x8a   :  { %v57_v30 = vpop.permute.xlu1 %56 }
  0xe3   :  { %v145_v52 = vpop.f32.mrb[0].mxu1 }
  0xe4   :  { %v147_v53 = vpop.f32.mrb[1].mxu1  ;;  %v146_v2 = vadd.f32 %v145_v52, %v42_v0 }
  0xe5   :  { %v148_v4 = vadd.f32 %v147_v53, %v42_v0 }
  0xe7   :  { %v156_v54 = vpop.f32.mrb[2].mxu1 }
  0xe8   :  { %v158_v55 = vpop.f32.mrb[3].mxu1  ;;  %v157_v13 = vadd.f32 %v156_v54, %v47_v10 }
  0xe9   :  { %v159_v16 = vadd.f32 %v158_v55, %v47_v10 }
  0xf3   :  { %v274_v56 = vpop.f32.mrb[4].mxu1 }
  0xf4   :  { %v276_v57 = vpop.f32.mrb[5].mxu1  ;;  %v1446_v25 = vadd.f32 %v274_v56, %v52_v11 }
  0xf5   :  { %v1448_v29 = vadd.f32 %v276_v57, %v52_v11 }
  0xf7   :  { %v281_v58 = vpop.f32.mrb[6].mxu1 }
  0xf8   :  { %v283_v59 = vpop.f32.mrb[7].mxu1  ;;  %v1450_v36 = vadd.f32 %v281_v58, %v57_v30 }
  0xf9   :  { %v1452_v41 = vadd.f32 %v283_v59, %v57_v30  ;;  %v790_v30 = vand.u32 4294901760, %v1753_v28 }
 0x11b   :  { %v658_v5 = vpop.f32.mrb[0].mxu0 }
 0x11c   :  { %v1439_v8 = vadd.f32 %v658_v5, %v146_v2  ;;  %v660_v9 = vpop.f32.mrb[1].mxu0 }
 0x11d   :  { %v1441_v12 = vadd.f32 %v660_v9, %v148_v4 }
 0x11e   :  { %v684_v14 = vmax.f32 %v1439_v8, 0.0 }
 0x11f   :  { %v685_v17 = vmax.f32 %v1441_v12, 0.0  ;;  %v665_v18 = vpop.f32.mrb[2].mxu0 }
 0x120   :  { %v715_v20 = vand.u32 4294901760, %v684_v14  ;;  %v1443_v21 = vadd.f32 %v665_v18, %v157_v13  ;;  %v667_v22 = vpop.f32.mrb[3].mxu0 }
 0x121   :  { %v713_v23 = vand.u32 4294901760, %v685_v17  ;;  %v1445_v24 = vadd.f32 %v667_v22, %v159_v16 }
 0x122   :  { %v1748_v26 = vsub.f32 %v684_v14, %v715_v20  ;;  %v686_v27 = vmax.f32 %v1443_v21, 0.0 }
 0x123   :  { %v1755_v31 = vsub.f32 %v685_v17, %v713_v23  ;;  %v687_v32 = vmax.f32 %v1445_v24, 0.0  ;;  %v672_v33 = vpop.f32.mrb[4].mxu0 }
 0x124   :  { %v816_v35 = vand.u32 4294901760, %v1748_v26  ;;  %v719_v37 = vand.u32 4294901760, %v686_v27  ;;  %v1447_v38 = vadd.f32 %v1446_v25, %v672_v33  ;;  %v674_v39 = vpop.f32.mrb[5].mxu0 }
 0x125   :  { %v810_v40 = vand.u32 4294901760, %v1755_v31  ;;  %v717_v42 = vand.u32 4294901760, %v687_v32  ;;  %v1449_v43 = vadd.f32 %v1448_v29, %v674_v39 }
 0x126   :  { %v817_v44 = vsub.f32 %v1748_v26, %v816_v35  ;;  %v1761_v45 = vpack.c.bf16 %v719_v37, %v715_v20  ;;  %v1763_v46 = vsub.f32 %v686_v27, %v719_v37  ;;  %v688_v47 = vmax.f32 %v1447_v38, 0.0 }
 0x127   :  { %v1765_v48 = vsub.f32 %v687_v32, %v717_v42  ;;  %v689_v49 = vmax.f32 %v1449_v43, 0.0  ;;  %v679_v50 = vpop.f32.mrb[6].mxu0  ;;  %v1767_v51 = vpack.c.bf16 %v717_v42, %v713_v23  ;;  %v811_v52 = vsub.f32 %v1755_v31, %v810_v40 }
 0x128   :  { %v818_v53 = vand.u32 4294901760, %v817_v44  ;;  %v828_v54 = vand.u32 4294901760, %v1763_v46  ;;  %v723_v55 = vand.u32 4294901760, %v688_v47  ;;  %v1451_v56 = vadd.f32 %v1450_v36, %v679_v50  ;;  %v681_v57 = vpop.f32.mrb[7].mxu0 }
 0x129   :  { %v822_v58 = vand.u32 4294901760, %v1765_v48  ;;  %v721_v59 = vand.u32 4294901760, %v689_v49  ;;  %v1453_v60 = vadd.f32 %v1452_v41, %v681_v57  ;;  %1389 = vmatprep.subr.bf16.mxu1 %v1767_v51  ;;  %v812_v61 = vand.u32 4294901760, %v811_v52 }
 0x12a   :  { %v829_v62 = vsub.f32 %v1763_v46, %v828_v54  ;;  %v839_v0 = vsub.f32 %v688_v47, %v723_v55  ;;  %v690_v1 = vmax.f32 %v1451_v56, 0.0  ;;  %1391 = vmatpush1.bf16.msra.mxu1 %v1761_v45  ;;  %v1404_v2 = vpack.c.bf16 %v1765_v48, %v1755_v31 }
 0x12b   :  { %v833_v4 = vsub.f32 %v689_v49, %v721_v59  ;;  %v691_v5 = vmax.f32 %v1453_v60, 0.0  ;;  %v823_v8 = vsub.f32 %v1765_v48, %v822_v58  ;;  %v1406_v9 = vpack.c.bf16 %v1763_v46, %v1748_v26 }
 0x12c   :  { %v830_v10 = vand.u32 4294901760, %v829_v62  ;;  %v840_v11 = vand.u32 4294901760, %v839_v0  ;;  %v727_v12 = vand.u32 4294901760, %v690_v1  ;;  %v1420_v13 = vpack.c.bf16 %v822_v58, %v810_v40 }
 0x12d   :  { %v834_v14 = vand.u32 4294901760, %v833_v4  ;;  %v725_v16 = vand.u32 4294901760, %v691_v5  ;;  %v824_v17 = vand.u32 4294901760, %v823_v8  ;;  %v1422_v18 = vpack.c.bf16 %v828_v54, %v816_v35 }
 0x12e   :  { %v1780_v20 = vpack.c.bf16 %v727_v12, %v723_v55  ;;  %v851_v21 = vsub.f32 %v690_v1, %v727_v12  ;;  %v1398_v22 = vpack.c.bf16 %v830_v10, %v818_v53  ;;  %v841_v27 = vsub.f32 %v839_v0, %v840_v11 }
 0x12f   :  { %v845_v23 = vsub.f32 %v691_v5, %v725_v16  ;;  %v1392_v24 = vpack.c.bf16 %v725_v16, %v721_v59  ;;  %v1396_v25 = vpack.c.bf16 %v824_v17, %v812_v61  ;;  %v800_v32 = vsub.f32 %v1746_v19, %v799_v34 }
 0x130   :  { %v852_v29 = vand.u32 4294901760, %v851_v21  ;;  %v1410_v26 = vpack.c.bf16 %v851_v21, %v839_v0  ;;  %v835_v33 = vsub.f32 %v833_v4, %v834_v14  ;;  %v842_v40 = vand.u32 4294901760, %v841_v27 }
 0x131   :  { %v846_v31 = vand.u32 4294901760, %v845_v23  ;;  %1393 = vmatprep.subr.bf16.mxu1 %v1392_v24  ;;  %v1408_v35 = vpack.c.bf16 %v845_v23, %v833_v4  ;;  %v801_v28 = vand.u32 4294901760, %v800_v32  ;;  %v1345_v59 = vlaneseq }
 0x132   :  { %v853_v36 = vsub.f32 %v851_v21, %v852_v29  ;;  %1395 = vmatpush1.bf16.msra.mxu1 %v1780_v20  ;;  %v1426_v37 = vpack.c.bf16 %v852_v29, %v840_v11  ;;  %v836_v42 = vand.u32 4294901760, %v835_v33 }
 0x133   :  { %1397 = vmatprep.subr.bf16.mxu1 %v1396_v25  ;;  %v847_v38 = vsub.f32 %v845_v23, %v846_v31  ;;  %v1424_v39 = vpack.c.bf16 %v846_v31, %v834_v14  ;;  %v1346_v1 = vshrl.u32 %v1345_v59, 7  ;;  %vm1371_vm2 = vcmp.lt.s32.totalorder %v1345_v59, 256 }
 0x134   :  { %v854_v41 = vand.u32 4294901760, %v853_v36 }
 0x135   :  { %791 = vmatmul.mubr.f32.vlgmr.msra.gmra.mrb[8].mxu1 %v790_v30  ;;  %v848_v43 = vand.u32 4294901760, %v847_v38  ;;  %v1347_v11 = vsub.s32 0, %v1346_v1 }
 0x136   :  { %1399 = vmatpush1.bf16.msra.mxu1 %v1398_v22  ;;  %796 = vmatprep.mubr.f32.mxu1 %v1540_v6  ;;  %v1402_v44 = vpack.c.bf16 %v854_v41, %v842_v40 }
 0x137   :  { %v1400_v46 = vpack.c.bf16 %v848_v43, %v836_v42 }
 0x139   :  { %802 = vmatmul.mubr.f32.gmra.mrb[10].mxu1 %v801_v28  ;;  %1401 = vmatprep.subr.bf16.mxu1 %v1400_v46 }
 0x13a   :  { %1403 = vmatpush1.bf16.msra.mxu1 %v1402_v44  ;;  %912 = vmatprep.mubr.f32.mxu1 %v1540_v6 }
 0x13b   :  { %1405 = vmatprep.subr.bf16.mxu1 %v1404_v2 }
 0x13d   :  { %914 = vmatmul.mubr.f32.vlgmr.msra.gmra.mrb[8].mxu1 %v1737_v63 }
 0x13e   :  { %1407 = vmatpush1.bf16.msra.mxu1 %v1406_v9  ;;  %919 = vmatprep.mubr.f32.mxu1 %v1540_v6  ;;  %v1542_v9 = vmov 1966171168  }
 0x13f   :  { %1409 = vmatprep.subr.bf16.mxu1 %v1408_v35  ;;  %v1355_v10 = vunpack.c.l.s4 %v1542_v9 }
 0x141   :  { %921 = vmatmul.mubr.f32.gmra.mrb[10].mxu1 %v1742_v7 }
 0x142   :  { %1411 = vmatpush1.bf16.msra.mxu1 %v1410_v26  ;;  %1007 = vmatprep.mubr.f32.mxu1 %v1540_v6 }
 0x143   :  { %1413 = vmatprep.subr.bf16.mxu1 %v1767_v51 }
 0x145   :  { %1010 = vmatmul.mubr.f32.vlgmr.msra.gmra.mrb[8].mxu1 %v1740_v3  ;;  %v699_v3 = vpop.permute.xlu0 %698 }
 0x146   :  { %1415 = vmatpush1.bf16.msra.mxu1 %v1761_v45  ;;  %1015 = vmatprep.mubr.f32.mxu1 %v1540_v6 }
 0x147   :  { %1417 = vmatprep.subr.bf16.mxu1 %v1392_v24 }
 0x149   :  { %1018 = vmatmul.mubr.f32.gmra.mrb[10].mxu1 %v1746_v19  ;;  %v1314_v55 = vpop.permute.xlu0 %1313 }
 0x14a   :  { %1419 = vmatpush1.bf16.msra.mxu1 %v1780_v20  ;;  %1096 = vmatprep.mubr.f32.mxu1 %v1540_v6 }
 0x14b   :  { %1421 = vmatprep.subr.bf16.mxu1 %v1420_v13 }
 0x14d   :  { %1100 = vmatmul.mubr.f32.vlgmr.msra.gmra.mrb[8].mxu1 %v788_v15  ;;  %v1343_v13 = vpop.permute.xlu0 %1342 }
 0x14e   :  { %1423 = vmatpush1.bf16.msra.mxu1 %v1422_v18  ;;  %1105 = vmatprep.mubr.f32.mxu1 %v1540_v6  ;;  %v1356_v18 = vunpack.c.0.s8 %v1355_v10 }
 0x14f   :  { %1425 = vmatprep.subr.bf16.mxu1 %v1424_v39 }
 0x150   :  { %v1359_v25 = vsub.s32 %v1356_v18, %v1346_v1 }
 0x151   :  { %1109 = vmatmul.mubr.f32.gmra.mrb[10].mxu1 %v799_v34 }
 0x152   :  { %1427 = vmatpush1.bf16.msra.mxu1 %v1426_v37  ;;  %1203 = vmatprep.mubr.f32.mxu1 %v1540_v6 }
 0x153   :  { %1429 = vmatprep.subr.bf16.mxu1 %v1767_v51 }
 0x155   :  { %1205 = vmatmul.mubr.f32.vlgmr.msra.gmra.mrb[8].mxu1 %v1737_v63 }
 0x156   :  { %1431 = vmatpush1.bf16.msra.mxu1 %v1761_v45  ;;  %1210 = vmatprep.mubr.f32.mxu1 %v1540_v6  ;;  %v704_v45 = vpop.permute.xlu1 %703 }
 0x157   :  { %1433 = vmatprep.subr.bf16.mxu1 %v1392_v24 }
 0x159   :  { %1212 = vmatmul.mubr.f32.gmra.mrb[10].mxu1 %v1742_v7 }
 0x15a   :  { %1435 = vmatpush1.bf16.msra.mxu1 %v1780_v20  ;;  %1290 = vmatprep.mubr.f32.mxu1 %v1540_v6  ;;  %v1319_v56 = vpop.permute.xlu1 %1318  ;;  %v1348_v20 = vrot.slane %v1343_v13, %v1347_v11 }
 0x15d   :  { %1292 = vmatmul.mubr.f32.vlgmr.msra.gmra.mrb[8].mxu1 %v1737_v63 }
 0x15e   :  { %1297 = vmatprep.mubr.f32.mxu1 %v1540_v6 }
 0x161   :  { %1299 = vmatmul.mubr.f32.gmra.mrb[10].mxu1 %v1742_v7 }
 0x230   :  { %v1293_v15 = vpop.f32.mrb[8].mxu1 }
 0x231   :  { %v1454_v19 = vadd.f32 %v1293_v15, %v699_v3  ;;  %v1295_v34 = vpop.f32.mrb[9].mxu1 }
 0x232   :  { %v1455_v47 = vadd.f32 %v1295_v34, %v699_v3 }
 0x233   :  { %v1305_v49 = vmax.f32 %v1454_v19, 0.0 }
 0x234   :  { %v1300_v48 = vpop.f32.mrb[10].mxu1  ;;  %v1306_v52 = vmax.f32 %v1455_v47, 0.0 }
 0x235   :  { %v1456_v50 = vadd.f32 %v1300_v48, %v704_v45  ;;  %v1302_v51 = vpop.f32.mrb[11].mxu1  ;;  %v1321_v57 = vmul.f32 %v1314_v55, %v1305_v49 }
 0x236   :  { %v1457_v53 = vadd.f32 %v1302_v51, %v704_v45  ;;  %v1322_v58 = vmul.f32 %v1314_v55, %v1306_v52 }
 0x237   :  { %v1307_v54 = vmax.f32 %v1456_v50, 0.0 }
 0x238   :  { %v1308_v63 = vmax.f32 %v1457_v53, 0.0 }
 0x239   :  { %v1323_v6 = vmul.f32 %v1319_v56, %v1307_v54 }
 0x23a   :  { %v1324_v7 = vmul.f32 %v1319_v56, %v1308_v63 }
 0x23b   :  { %v1325_v60 = vadd.f32 %v1323_v6, %v1321_v57 }
 0x23c   :  { %v1332_v61 = vadd.f32 %v1324_v7, %v1322_v58 }
 0x23d   :  { %v1326_v62 = vrot.slane %v1325_v60, 4 }
 0x23e   :  { %v1333_v0 = vrot.slane %v1332_v61, 4 }
 0x23f   :  { %v1327_v2 = vadd.f32 %v1326_v62, %v1325_v60 }
 0x240   :  { %v1334_v4 = vadd.f32 %v1333_v0, %v1332_v61 }
 0x241   :  { %v1328_v5 = vrot.slane %v1327_v2, 2 }
 0x242   :  { %v1335_v8 = vrot.slane %v1334_v4, 2 }
 0x243   :  { %v1329_v12 = vadd.f32 %v1328_v5, %v1327_v2 }
 0x244   :  { %v1336_v14 = vadd.f32 %v1335_v8, %v1334_v4 }
 0x245   :  { %v1330_v16 = vrot.slane %v1329_v12, 1 }
 0x246   :  { %v1337_v17 = vrot.slane %v1336_v14, 1 }
 0x247   :  { %v1331_v21 = vadd.f32 %v1330_v16, %v1329_v12 }
 0x248   :  { %v1338_v22 = vadd.f32 %v1337_v17, %v1336_v14 }
 0x249   :  { %v1349_v23 = vadd.f32 %v1348_v20, %v1331_v21 }
 0x24a   :  { %v1350_v24 = vadd.f32 %v1348_v20, %v1338_v22 }
 0x24c   :  { %v1353_v27 = vcombine.low %v1349_v23, %v1350_v24 }
 0x24e   :  { %v1360_v29 = vrot.slane %v1353_v27, %v1359_v25 }
 0x250   :  { %v1367_v30 = vrot.slane %v1360_v29, %v1359_v25 }
 0x252   :  { %1373 = vst.msk [vmem:[#allocation3] sm:$0x3] %vm1371_vm2, %v1367_v30 }
 0x253   :  { %1527 = shalt.err (!%p1524_p4)
}
 0x254   :  { %s1528_s9 = scalar_lea.hbm %s1835_s7, 32 }
 0x255   :  { %p1529_p5 = scmp.ne.s32.totalorder %s1835_s7, %s1528_s9  ;;  %p1532_p6 = scmp.lt.u32.totalorder %s1528_s9, %s1835_s7 }
 0x257   :  { %p1534_p7 = pnand %p1532_p6, %p1529_p5 }
 0x259   :  { %1537 = shalt.err (!%p1534_p7)
}
 0x25a   :  { %1383 = dma.vmem_to_hbm [thread:$0]  %s1381_s29, 32, %s1835_s7, [#allocation4]  }
 0x25b   :  { %1538 = dma.done.wait [#allocation4], 32  }
 0x25c   :  { %1539 = vsyncadd [#allocation4], 4294967264 }
 0x25d   :  { %1387 = vsyncpa [#allocation4], 1 }

</bundles_post_ra>
